<compile_context>
chip_gen: v7x
topology: tpu7x:2x2x1
jax: 0.10.0
libtpu: 0.0.40
codegen_flags: <defaults>
</compile_context>

<pallas_src>
from functools import partial

import numpy as np
import jax
import jax.numpy as jnp
from jax import lax
from jax.experimental import pallas as pl
from jax.experimental.pallas import tpu as pltpu


def _round_up(x, m):
    return ((x + m - 1) // m) * m


def _sublane_multiple(itemsize):
    # Sub-32-bit dtypes pack rows along sublanes (2/4 rows per sublane); rounding
    # the row dim to 16 (bf16) / 32 (8-bit) avoids masked / packed relayouts.
    return {4: 8, 2: 16, 1: 32}.get(int(itemsize), 8)


def _vmem_budget_and_limit():
    """Per-generation VMEM sizing: v5e/v6e have 128 MiB, v7x only 64 MiB per TC."""
    cap = 64 << 20                               # safe lower bound (v7x per-TC VMEM)
    try:
        info = pltpu.get_tpu_info()
        cap = int(getattr(info, "vmem_capacity_bytes", cap)) or cap
    except Exception:
        pass
    budget = min(cap // 2, 48 << 20)             # bytes for our double-buffered blocks
    limit = max(min(cap - (16 << 20), budget + (16 << 20)), budget + (4 << 20))
    return budget, limit


# --------------------------------------------------------------------------
# Kernel 1: get_embedding  (chunked HBM row gather + scale_emb + vision overwrite)
# --------------------------------------------------------------------------
def _embed_gather_kernel(ids_ref, vidx_ref,            # scalar prefetch (SMEM)
                         scale_ref, emb_hbm, vis_hbm,  # inputs
                         out_ref,                      # (T, H) output block
                         buf, sems,                    # scratch
                         *, chunk_tokens):
    T = chunk_tokens
    c = pl.program_id(0)
    nc = pl.num_programs(0)
    slot = c % 2

    def issue(chunk, slot_):
        def body(t, carry):
            pos = chunk * T + t
            vi = vidx_ref[pos]

            @pl.when(vi >= 0)                  # vision token: gather vision row
            def _():
                pltpu.make_async_copy(vis_hbm.at[vi], buf.at[slot_, t],
                                      sems.at[slot_, t]).start()

            @pl.when(vi < 0)                   # text token: gather embedding row
            def _():
                pltpu.make_async_copy(emb_hbm.at[ids_ref[pos]], buf.at[slot_, t],
                                      sems.at[slot_, t]).start()
            return carry
        lax.fori_loop(0, T, body, 0)

    @pl.when(c == 0)                           # prime the pipeline
    def _():
        issue(0, 0)

    @pl.when(c + 1 < nc)                       # prefetch next chunk into other slot
    def _():
        issue(c + 1, 1 - slot)

    def wait_body(t, carry):
        pltpu.make_async_copy(emb_hbm.at[0], buf.at[slot, t],
                              sems.at[slot, t]).wait()
        return carry
    lax.fori_loop(0, T, wait_body, 0)

    rows = buf[slot].astype(jnp.float32)                    # (T, H)
    out_ref[...] = (rows * scale_ref[...]).astype(out_ref.dtype)


def get_embedding(input_ids, vis_idx, embed_table, vision_embeds_flat,
                  scale_emb=1.0, *, chunk_tokens=16):
    """input_ids: (S,) int; vis_idx: (S,) int (-1 for non-image tokens, otherwise a
    row index into vision_embeds_flat); embed_table: (V, H); vision: (NV, H)."""
    S = int(input_ids.shape[0])
    V, H = embed_table.shape

    if vision_embeds_flat is None or vision_embeds_flat.shape[0] == 0:
        vision_embeds_flat = jnp.zeros((1, H), embed_table.dtype)
    vision_embeds_flat = vision_embeds_flat.astype(embed_table.dtype)

    T = int(chunk_tokens)
    S_p = _round_up(max(S, 1), T)

    ids = jnp.zeros((S_p,), jnp.int32).at[:S].set(input_ids.astype(jnp.int32))
    vidx = jnp.full((S_p,), -1, jnp.int32).at[:S].set(vis_idx.astype(jnp.int32))
    # scale_emb on text rows; 1.0 on vision rows (vision states are written unscaled)
    row_scale = jnp.where(vidx >= 0, jnp.float32(1.0),
                          jnp.float32(scale_emb))[:, None]        # (S_p, 1)

    kernel = partial(_embed_gather_kernel, chunk_tokens=T)

    out = pl.pallas_call(
        kernel,
        out_shape=jax.ShapeDtypeStruct((S_p, H), embed_table.dtype),
        grid_spec=pltpu.PrefetchScalarGridSpec(
            num_scalar_prefetch=2,             # ids, vidx -> SMEM
            grid=(S_p // T,),
            in_specs=[
                pl.BlockSpec((T, 1), lambda c, ids, vidx: (c, 0)),  # row_scale
                pl.BlockSpec(memory_space=pl.ANY),                  # embed table (HBM)
                pl.BlockSpec(memory_space=pl.ANY),                  # vision rows (HBM)
            ],
            out_specs=pl.BlockSpec((T, H), lambda c, ids, vidx: (c, 0)),
            scratch_shapes=[
                pltpu.VMEM((2, T, H), embed_table.dtype),
                pltpu.SemaphoreType.DMA((2, T)),
            ]),
        # Cross-step double buffering keeps state in scratch -> sequential axis.
        # TODO(synk): on v7x the chunk axis could be split across both TensorCores
        #             by dropping the cross-step prefetch and marking it parallel.
        compiler_params=pltpu.CompilerParams(
            dimension_semantics=("arbitrary",)),
    )(ids, vidx, row_scale, embed_table, vision_embeds_flat)

    return out[:S] if S_p != S else out


# --------------------------------------------------------------------------
# Kernel 2: compute_logits  (lm_head projection, tiled MXU matmul)
# --------------------------------------------------------------------------
def _lm_head_kernel_single_k(h_ref, w_ref, o_ref):
    # Whole hidden dim in one block: no accumulator, no zero-init, no final copy.
    o_ref[...] = jnp.dot(h_ref[...], w_ref[...],
                         preferred_element_type=jnp.float32).astype(o_ref.dtype)


def _lm_head_kernel_acc(h_ref, w_ref, o_ref, acc_ref):
    @pl.when(pl.program_id(2) == 0)
    def _():
        acc_ref[...] = jnp.zeros_like(acc_ref)

    acc_ref[...] += jnp.dot(h_ref[...], w_ref[...],
                            preferred_element_type=jnp.float32)

    @pl.when(pl.program_id(2) == pl.num_programs(2) - 1)
    def _():
        o_ref[...] = acc_ref[...].astype(o_ref.dtype)


def lm_head_tile_config(hidden_size, vocab_size, param_dtype,
                        out_dtype=jnp.float32, tm_cap=512):
    """Choose (tn, tk) once per (H, V, dtype) from the per-generation VMEM budget."""
    in_b = jnp.dtype(param_dtype).itemsize
    out_b = jnp.dtype(out_dtype).itemsize
    budget, vmem_limit = _vmem_budget_and_limit()
    H128 = _round_up(hidden_size, 128)
    V128 = _round_up(vocab_size, 128)

    def blocks_bytes(tm, tn, tk, nk):
        return (2 * tm * tk * in_b                    # h, double-buffered
                + 2 * tk * tn * in_b                  # w, double-buffered
                + 2 * tm * tn * out_b                 # out, double-buffered
                + (tm * tn * 4 if nk > 1 else 0))     # f32 accumulator

    tn = min(V128, 2048)
    tk = H128
    # Prefer a single k block (nk == 1: no accumulator, weight padded only along V);
    # shrink the vocab tile first, only then split the hidden axis.
    while tn > 128 and blocks_bytes(tm_cap, tn, tk, 1) > budget:
        tn = max(128, _round_up(tn // 2, 128))
    if blocks_bytes(tm_cap, tn, tk, 1) > budget:
        while tk > 128 and blocks_bytes(tm_cap, tn, tk, 2) > budget:
            tk = max(128, _round_up(tk // 2, 128))
    return dict(tn=int(tn), tk=int(tk), tm_cap=int(tm_cap),
                vmem_limit=int(vmem_limit), out_dtype=out_dtype)


def prepare_lm_head(lm_head_weight, cfg):
    """One-time, weight-load-time prep: (V, H) ParallelLMHead weight -> transposed,
    tile-padded (H_p, V_p).  Never done per forward call.
    TODO(synk): an int8 weight stream on v5e/v6e (fp8 on v7x) would halve HBM bytes
                at decode; kept in the native dtype here."""
    V, H = lm_head_weight.shape
    Hp, Vp = _round_up(H, cfg["tk"]), _round_up(V, cfg["tn"])
    wt = jnp.asarray(lm_head_weight).T                # (H, V)
    if (Hp, Vp) != (H, V):
        wt = jnp.pad(wt, ((0, Hp - H), (0, Vp - V)))
    return wt


def compute_logits(hidden_states, lm_head_prepared, vocab_size, cfg):
    """hidden_states: (S, H); lm_head_prepared: (H_p, V_p) from prepare_lm_head."""
    S, H = hidden_states.shape
    Hp, Vp = lm_head_prepared.shape
    out_dtype = cfg["out_dtype"]
    in_b = jnp.dtype(hidden_states.dtype).itemsize
    sub = _sublane_multiple(in_b)

    # Bucket S (powers of two below tm_cap, tm_cap-multiples above) so distinct
    # sequence lengths reuse a small set of compiled kernels.
    tm_cap = cfg["tm_cap"]
    if S <= tm_cap:
        S_p = _round_up(max(sub, int(pl.next_power_of_2(max(S, 1)))), sub)
        tm = S_p                                      # ni == 1: weight streamed once
    else:
        S_p = _round_up(S, tm_cap)
        tm = tm_cap
    tn, tk = cfg["tn"], cfg["tk"]

    h = hidden_states
    if (S_p, Hp) != (S, H):
        h = jnp.pad(h, ((0, S_p - S), (0, Hp - H)))   # activations only (small)

    ni, nj, nk = S_p // tm, Vp // tn, Hp // tk
    w_b = jnp.dtype(lm_head_prepared.dtype).itemsize
    cost = pl.CostEstimate(
        flops=2 * S_p * Vp * Hp, transcendentals=0,
        bytes_accessed=S_p * Hp * in_b + ni * Vp * Hp * w_b
                       + S_p * Vp * jnp.dtype(out_dtype).itemsize)
    params = pltpu.CompilerParams(
        dimension_semantics=(("parallel", "parallel", "arbitrary") if nk > 1
                             else ("parallel", "parallel")),
        vmem_limit_bytes=cfg["vmem_limit"])

    if nk == 1:
        logits = pl.pallas_call(
            _lm_head_kernel_single_k,
            out_shape=jax.ShapeDtypeStruct((S_p, Vp), out_dtype),
            grid_spec=pltpu.PrefetchScalarGridSpec(
                num_scalar_prefetch=0,
                grid=(ni, nj),
                in_specs=[pl.BlockSpec((tm, tk), lambda i, j: (i, 0)),
                          pl.BlockSpec((tk, tn), lambda i, j: (0, j))],
                out_specs=pl.BlockSpec((tm, tn), lambda i, j: (i, j))),
            compiler_params=params, cost_estimate=cost,
        )(h, lm_head_prepared)
    else:
        logits = pl.pallas_call(
            _lm_head_kernel_acc,
            out_shape=jax.ShapeDtypeStruct((S_p, Vp), out_dtype),
            grid_spec=pltpu.PrefetchScalarGridSpec(
                num_scalar_prefetch=0,
                grid=(ni, nj, nk),
                in_specs=[pl.BlockSpec((tm, tk), lambda i, j, k: (i, k)),
                          pl.BlockSpec((tk, tn), lambda i, j, k: (k, j))],
                out_specs=pl.BlockSpec((tm, tn), lambda i, j, k: (i, j)),
                scratch_shapes=[pltpu.VMEM((tm, tn), jnp.float32)]),
            compiler_params=params, cost_estimate=cost,
        )(h, lm_head_prepared)

    if (S_p, Vp) != (S, vocab_size):
        # Padded vocab columns are exact zeros; safe only because they are sliced
        # off here (a fused argmax over padded logits would need a -inf fill).
        logits = logits[:S, :vocab_size]
    return logits


# --------------------------------------------------------------------------
# Host-side glue reproducing _get_image_bounds / image_indices construction
# --------------------------------------------------------------------------
def image_bounds_np(ids_np, im_start_id, im_end_id,
                    slice_start_id=None, slice_end_id=None):
    # TODO(synk): torch.where with data-dependent output shape -> host-side numpy.
    start_cond = ids_np == im_start_id
    end_cond = ids_np == im_end_id
    if slice_start_id is not None:
        start_cond |= ids_np == slice_start_id
        end_cond |= ids_np == slice_end_id
    starts = np.where(start_cond)[0] + 1
    ends = np.where(end_cond)[0]
    # Length reconciliation: unmatched / truncated tags would make the original
    # torch.hstack raise; pair only up to the common count.
    n = min(len(starts), len(ends))
    if n == 0:
        return np.zeros((0, 2), np.int64)
    return np.stack([starts[:n], ends[:n]], axis=1)


def vis_index_from_bounds(bounds, seq_len):
    # Per-token row index into the flattened vision_hidden_states; -1 elsewhere.
    vi = -np.ones((seq_len,), np.int32)
    c = 0
    for s, e in bounds:
        for p in range(s, e):
            vi[p] = c
            c += 1
    return vi


# --------------------------------------------------------------------------
if __name__ == "__main__":
    # Small synthetic config (config.hidden_size, vocab_size, query_num, scale_emb).
    # V deliberately NOT a multiple of 128; S not a multiple of 8/16.
    V = 250      # vocab_size
    H = 256      # hidden_size / embed_dim
    S = 18       # sequence length
    NQ = 4       # image_feature_size (query_num) for the single image
    IM_START_ID, IM_END_ID = 240, 241
    SCALE_EMB = 2.0

    key = jax.random.PRNGKey(0)
    k1, k2, k3, k4 = jax.random.split(key, 4)

    # deterministic parameters (llm.embed_tokens, lm_head)
    embed_table = jax.random.normal(k1, (V, H), jnp.float32) * 0.02
    lm_head_weight = jax.random.normal(k2, (V, H), jnp.float32) * 0.02

    # image_embeds path of MiniCPMVImageEmbeddingInputs:
    # (batch*num_images, image_feature_size, hidden_size)
    image_embeds = jax.random.normal(k3, (1, NQ, H), jnp.float32)
    vision_hidden_states = image_embeds.reshape(-1, H)          # (NQ, H)

    # input_ids with an <im_start> ... NQ image tokens ... <im_end> span
    ids_np = np.array(jax.random.randint(k4, (S,), 0, 200), dtype=np.int32)
    ids_np[2] = IM_START_ID
    ids_np[3:3 + NQ] = 100
    ids_np[3 + NQ] = IM_END_ID
    input_ids = jnp.asarray(ids_np, jnp.int32)

    bounds = image_bounds_np(ids_np, IM_START_ID, IM_END_ID)    # [(3, 7)]
    vis_idx = jnp.asarray(vis_index_from_bounds(bounds, S), jnp.int32)

    # ---- weight-load-time prep (ONE TIME, not per forward) ----
    cfg_f32 = lm_head_tile_config(H, V, jnp.float32)
    w_f32 = prepare_lm_head(lm_head_weight, cfg_f32)

    cfg_bf16 = lm_head_tile_config(H, V, jnp.bfloat16)
    w_bf16 = prepare_lm_head(lm_head_weight.astype(jnp.bfloat16), cfg_bf16)

    # force a split hidden axis to exercise the accumulating (nk > 1) kernel
    cfg_split = dict(cfg_f32, tk=128)
    w_split = prepare_lm_head(lm_head_weight, cfg_split)

    # ---- forward: embeddings (with vision overwrite) -> [llm backbone: abstract]
    #      -> lm_head projection ----
    vlm_embeddings = get_embedding(input_ids, vis_idx, embed_table,
                                   vision_hidden_states, SCALE_EMB)
    vlm_embeddings = jax.block_until_ready(vlm_embeddings)

    logits = jax.block_until_ready(compute_logits(vlm_embeddings, w_f32, V, cfg_f32))
    logits_split = jax.block_until_ready(
        compute_logits(vlm_embeddings, w_split, V, cfg_split))
    logits_bf16 = jax.block_until_ready(
        compute_logits(vlm_embeddings.astype(jnp.bfloat16), w_bf16, V, cfg_bf16))

    # ---- silent correctness check against a pure-numpy reference ----
    ref_emb = np.asarray(embed_table)[ids_np] * SCALE_EMB
    vi = np.asarray(vis_idx)
    ref_emb[vi >= 0] = np.asarray(vision_hidden_states)[vi[vi >= 0]]
    ref_logits = ref_emb @ np.asarray(lm_head_weight).T

    np.testing.assert_allclose(np.asarray(vlm_embeddings), ref_emb,
                               rtol=2e-4, atol=2e-4)
    np.testing.assert_allclose(np.asarray(logits), ref_logits, rtol=2e-4, atol=2e-4)
    np.testing.assert_allclose(np.asarray(logits_split), ref_logits,
                               rtol=2e-4, atol=2e-4)
    np.testing.assert_allclose(np.asarray(logits_bf16), ref_logits,
                               rtol=5e-2, atol=5e-2)

    print("KERNEL_OK")
</pallas_src>

<mosaic_0001>
module attributes {stable_mosaic.version = 11 : i64} {
  func.func @_embed_gather_kernel(%arg0: i32, %arg1: memref<32xi32, #tpu.memory_space<smem>>, %arg2: memref<32xi32, #tpu.memory_space<smem>>, %arg3: memref<16x1xf32, #tpu.memory_space<vmem>>, %arg4: memref<250x256xf32, #tpu.memory_space<any>>, %arg5: memref<4x256xf32, #tpu.memory_space<any>>, %arg6: memref<16x256xf32, #tpu.memory_space<vmem>>, %arg7: memref<2x16x256xf32, #tpu.memory_space<vmem>>, %arg8: memref<2x16x!tpu.dma_semaphore, #tpu.memory_space<semaphore_mem>>) attributes {dimension_semantics = [#tpu.dimension_semantics<arbitrary>], iteration_bounds = array<i64: 2>, scalar_prefetch = 2 : i64, scratch_operands = 2 : i64, tpu.core_type = #tpu.core_type<tc>, window_params = [{transform_indices = @transform_0, window_bounds = array<i64: 16, 1>}, {}, {}, {transform_indices = @transform_3, window_bounds = array<i64: 16, 256>}]} {
    %c2_i32 = arith.constant 2 : i32
    %c0_i32 = arith.constant 0 : i32
    %0 = arith.cmpi eq, %c2_i32, %c0_i32 : i32
    %c1_i32 = arith.constant 1 : i32
    %1 = arith.select %0, %c1_i32, %c2_i32 : i32
    %2 = arith.remsi %arg0, %1 : i32
    %c0_i32_0 = arith.constant 0 : i32
    %3 = arith.cmpi ne, %2, %c0_i32_0 : i32
    %c0_i32_1 = arith.constant 0 : i32
    %4 = arith.cmpi slt, %2, %c0_i32_1 : i32
    %c0_i32_2 = arith.constant 0 : i32
    %5 = arith.cmpi slt, %1, %c0_i32_2 : i32
    %6 = arith.xori %4, %5 : i1
    %7 = arith.andi %6, %3 : i1
    %8 = arith.addi %2, %1 : i32
    %9 = arith.select %7, %8, %2 : i32
    %c0_i32_3 = arith.constant 0 : i32
    %10 = arith.cmpi eq, %arg0, %c0_i32_3 : i32
    %11 = arith.extui %10 : i1 to i32
    %c0_i32_4 = arith.constant 0 : i32
    %12 = arith.cmpi ne, %11, %c0_i32_4 : i32
    scf.if %12 {
      %c0_i32_16 = arith.constant 0 : i32
      %c16_i32_17 = arith.constant 16 : i32
      %25 = arith.addi %c0_i32_16, %c16_i32_17 : i32
      %c1_i32_18 = arith.constant 1 : i32
      scf.for %arg9 = %c0_i32_16 to %25 step %c1_i32_18  : i32 {
        %c0_i32_20 = arith.constant 0 : i32
        %26 = arith.addi %c0_i32_20, %arg9 : i32
        %27 = arith.index_cast %26 : i32 to index
        %28 = memref.load %arg2[%27] : memref<32xi32, #tpu.memory_space<smem>>
        %c0_i32_21 = arith.constant 0 : i32
        %29 = arith.cmpi sge, %28, %c0_i32_21 : i32
        %30 = arith.extui %29 : i1 to i32
        %c0_i32_22 = arith.constant 0 : i32
        %31 = arith.cmpi ne, %30, %c0_i32_22 : i32
        scf.if %31 {
          %c0_i32_25 = arith.constant 0 : i32
          %c0_i32_26 = arith.constant 0 : i32
          %c0_i32_27 = arith.constant 0 : i32
          %35 = tpu.memref_slice %arg5[%28, %c0_i32_27] : memref<4x256xf32, #tpu.memory_space<any>> -> memref<1x256xf32, #tpu.memory_space<any>>
          %36 = tpu.memref_squeeze %35 : memref<1x256xf32, #tpu.memory_space<any>> -> memref<256xf32, #tpu.memory_space<any>>
          %c0_i32_28 = arith.constant 0 : i32
          %37 = tpu.memref_slice %arg7[%c0_i32_25, %arg9, %c0_i32_28] : memref<2x16x256xf32, #tpu.memory_space<vmem>> -> memref<1x1x256xf32, #tpu.memory_space<vmem>>
          %38 = tpu.memref_squeeze %37 : memref<1x1x256xf32, #tpu.memory_space<vmem>> -> memref<256xf32, #tpu.memory_space<vmem>>
          %39 = tpu.memref_slice %arg8[%c0_i32_26, %arg9] : memref<2x16x!tpu.dma_semaphore, #tpu.memory_space<semaphore_mem>> -> memref<1x1x!tpu.dma_semaphore, #tpu.memory_space<semaphore_mem>>
          %40 = tpu.memref_squeeze %39 : memref<1x1x!tpu.dma_semaphore, #tpu.memory_space<semaphore_mem>> -> memref<!tpu.dma_semaphore, #tpu.memory_space<semaphore_mem>>
          tpu.enqueue_dma source(%36 : memref<256xf32, #tpu.memory_space<any>>) target(%38 : memref<256xf32, #tpu.memory_space<vmem>>) target_semaphore(%40 : memref<!tpu.dma_semaphore, #tpu.memory_space<semaphore_mem>>)
        } else {
        }
        %c0_i32_23 = arith.constant 0 : i32
        %32 = arith.cmpi slt, %28, %c0_i32_23 : i32
        %33 = arith.extui %32 : i1 to i32
        %c0_i32_24 = arith.constant 0 : i32
        %34 = arith.cmpi ne, %33, %c0_i32_24 : i32
        scf.if %34 {
          %35 = arith.index_cast %26 : i32 to index
          %36 = memref.load %arg1[%35] : memref<32xi32, #tpu.memory_space<smem>>
          %c0_i32_25 = arith.constant 0 : i32
          %c0_i32_26 = arith.constant 0 : i32
          %c0_i32_27 = arith.constant 0 : i32
          %37 = tpu.memref_slice %arg4[%36, %c0_i32_27] : memref<250x256xf32, #tpu.memory_space<any>> -> memref<1x256xf32, #tpu.memory_space<any>>
          %38 = tpu.memref_squeeze %37 : memref<1x256xf32, #tpu.memory_space<any>> -> memref<256xf32, #tpu.memory_space<any>>
          %c0_i32_28 = arith.constant 0 : i32
          %39 = tpu.memref_slice %arg7[%c0_i32_25, %arg9, %c0_i32_28] : memref<2x16x256xf32, #tpu.memory_space<vmem>> -> memref<1x1x256xf32, #tpu.memory_space<vmem>>
          %40 = tpu.memref_squeeze %39 : memref<1x1x256xf32, #tpu.memory_space<vmem>> -> memref<256xf32, #tpu.memory_space<vmem>>
          %41 = tpu.memref_slice %arg8[%c0_i32_26, %arg9] : memref<2x16x!tpu.dma_semaphore, #tpu.memory_space<semaphore_mem>> -> memref<1x1x!tpu.dma_semaphore, #tpu.memory_space<semaphore_mem>>
          %42 = tpu.memref_squeeze %41 : memref<1x1x!tpu.dma_semaphore, #tpu.memory_space<semaphore_mem>> -> memref<!tpu.dma_semaphore, #tpu.memory_space<semaphore_mem>>
          tpu.enqueue_dma source(%38 : memref<256xf32, #tpu.memory_space<any>>) target(%40 : memref<256xf32, #tpu.memory_space<vmem>>) target_semaphore(%42 : memref<!tpu.dma_semaphore, #tpu.memory_space<semaphore_mem>>)
        } else {
        }
      }
      %c16_i32_19 = arith.constant 16 : i32
    } else {
    }
    %c1_i32_5 = arith.constant 1 : i32
    %13 = arith.addi %arg0, %c1_i32_5 : i32
    %c2_i32_6 = arith.constant 2 : i32
    %14 = arith.cmpi slt, %13, %c2_i32_6 : i32
    %15 = arith.extui %14 : i1 to i32
    %c0_i32_7 = arith.constant 0 : i32
    %16 = arith.cmpi ne, %15, %c0_i32_7 : i32
    scf.if %16 {
      %c1_i32_16 = arith.constant 1 : i32
      %25 = arith.addi %arg0, %c1_i32_16 : i32
      %c1_i32_17 = arith.constant 1 : i32
      %26 = arith.subi %c1_i32_17, %9 : i32
      %c0_i32_18 = arith.constant 0 : i32
      %c16_i32_19 = arith.constant 16 : i32
      %27 = arith.addi %c0_i32_18, %c16_i32_19 : i32
      %c1_i32_20 = arith.constant 1 : i32
      scf.for %arg9 = %c0_i32_18 to %27 step %c1_i32_20  : i32 {
        %c16_i32_22 = arith.constant 16 : i32
        %28 = arith.muli %25, %c16_i32_22 : i32
        %29 = arith.addi %28, %arg9 : i32
        %30 = arith.index_cast %29 : i32 to index
        %31 = memref.load %arg2[%30] : memref<32xi32, #tpu.memory_space<smem>>
        %c0_i32_23 = arith.constant 0 : i32
        %32 = arith.cmpi sge, %31, %c0_i32_23 : i32
        %33 = arith.extui %32 : i1 to i32
        %c0_i32_24 = arith.constant 0 : i32
        %34 = arith.cmpi ne, %33, %c0_i32_24 : i32
        scf.if %34 {
          %c0_i32_27 = arith.constant 0 : i32
          %38 = tpu.memref_slice %arg5[%31, %c0_i32_27] : memref<4x256xf32, #tpu.memory_space<any>> -> memref<1x256xf32, #tpu.memory_space<any>>
          %39 = tpu.memref_squeeze %38 : memref<1x256xf32, #tpu.memory_space<any>> -> memref<256xf32, #tpu.memory_space<any>>
          %c0_i32_28 = arith.constant 0 : i32
          %40 = tpu.memref_slice %arg7[%26, %arg9, %c0_i32_28] : memref<2x16x256xf32, #tpu.memory_space<vmem>> -> memref<1x1x256xf32, #tpu.memory_space<vmem>>
          %41 = tpu.memref_squeeze %40 : memref<1x1x256xf32, #tpu.memory_space<vmem>> -> memref<256xf32, #tpu.memory_space<vmem>>
          %42 = tpu.memref_slice %arg8[%26, %arg9] : memref<2x16x!tpu.dma_semaphore, #tpu.memory_space<semaphore_mem>> -> memref<1x1x!tpu.dma_semaphore, #tpu.memory_space<semaphore_mem>>
          %43 = tpu.memref_squeeze %42 : memref<1x1x!tpu.dma_semaphore, #tpu.memory_space<semaphore_mem>> -> memref<!tpu.dma_semaphore, #tpu.memory_space<semaphore_mem>>
          tpu.enqueue_dma source(%39 : memref<256xf32, #tpu.memory_space<any>>) target(%41 : memref<256xf32, #tpu.memory_space<vmem>>) target_semaphore(%43 : memref<!tpu.dma_semaphore, #tpu.memory_space<semaphore_mem>>)
        } else {
        }
        %c0_i32_25 = arith.constant 0 : i32
        %35 = arith.cmpi slt, %31, %c0_i32_25 : i32
        %36 = arith.extui %35 : i1 to i32
        %c0_i32_26 = arith.constant 0 : i32
        %37 = arith.cmpi ne, %36, %c0_i32_26 : i32
        scf.if %37 {
          %38 = arith.index_cast %29 : i32 to index
          %39 = memref.load %arg1[%38] : memref<32xi32, #tpu.memory_space<smem>>
          %c0_i32_27 = arith.constant 0 : i32
          %40 = tpu.memref_slice %arg4[%39, %c0_i32_27] : memref<250x256xf32, #tpu.memory_space<any>> -> memref<1x256xf32, #tpu.memory_space<any>>
          %41 = tpu.memref_squeeze %40 : memref<1x256xf32, #tpu.memory_space<any>> -> memref<256xf32, #tpu.memory_space<any>>
          %c0_i32_28 = arith.constant 0 : i32
          %42 = tpu.memref_slice %arg7[%26, %arg9, %c0_i32_28] : memref<2x16x256xf32, #tpu.memory_space<vmem>> -> memref<1x1x256xf32, #tpu.memory_space<vmem>>
          %43 = tpu.memref_squeeze %42 : memref<1x1x256xf32, #tpu.memory_space<vmem>> -> memref<256xf32, #tpu.memory_space<vmem>>
          %44 = tpu.memref_slice %arg8[%26, %arg9] : memref<2x16x!tpu.dma_semaphore, #tpu.memory_space<semaphore_mem>> -> memref<1x1x!tpu.dma_semaphore, #tpu.memory_space<semaphore_mem>>
          %45 = tpu.memref_squeeze %44 : memref<1x1x!tpu.dma_semaphore, #tpu.memory_space<semaphore_mem>> -> memref<!tpu.dma_semaphore, #tpu.memory_space<semaphore_mem>>
          tpu.enqueue_dma source(%41 : memref<256xf32, #tpu.memory_space<any>>) target(%43 : memref<256xf32, #tpu.memory_space<vmem>>) target_semaphore(%45 : memref<!tpu.dma_semaphore, #tpu.memory_space<semaphore_mem>>)
        } else {
        }
      }
      %c16_i32_21 = arith.constant 16 : i32
    } else {
    }
    %c0_i32_8 = arith.constant 0 : i32
    %c16_i32 = arith.constant 16 : i32
    %17 = arith.addi %c0_i32_8, %c16_i32 : i32
    %c1_i32_9 = arith.constant 1 : i32
    scf.for %arg9 = %c0_i32_8 to %17 step %c1_i32_9  : i32 {
      %c0_i32_16 = arith.constant 0 : i32
      %c0_i32_17 = arith.constant 0 : i32
      %25 = tpu.memref_slice %arg4[%c0_i32_16, %c0_i32_17] : memref<250x256xf32, #tpu.memory_space<any>> -> memref<1x256xf32, #tpu.memory_space<any>>
      %26 = tpu.memref_squeeze %25 : memref<1x256xf32, #tpu.memory_space<any>> -> memref<256xf32, #tpu.memory_space<any>>
      %c0_i32_18 = arith.constant 0 : i32
      %27 = tpu.memref_slice %arg7[%9, %arg9, %c0_i32_18] : memref<2x16x256xf32, #tpu.memory_space<vmem>> -> memref<1x1x256xf32, #tpu.memory_space<vmem>>
      %28 = tpu.memref_squeeze %27 : memref<1x1x256xf32, #tpu.memory_space<vmem>> -> memref<256xf32, #tpu.memory_space<vmem>>
      %29 = tpu.memref_slice %arg8[%9, %arg9] : memref<2x16x!tpu.dma_semaphore, #tpu.memory_space<semaphore_mem>> -> memref<1x1x!tpu.dma_semaphore, #tpu.memory_space<semaphore_mem>>
      %30 = tpu.memref_squeeze %29 : memref<1x1x!tpu.dma_semaphore, #tpu.memory_space<semaphore_mem>> -> memref<!tpu.dma_semaphore, #tpu.memory_space<semaphore_mem>>
      tpu.wait_dma2 semaphore(%30 : memref<!tpu.dma_semaphore, #tpu.memory_space<semaphore_mem>>) src(%26 : memref<256xf32, #tpu.memory_space<any>>) dst(%28 : memref<256xf32, #tpu.memory_space<vmem>>)
    }
    %c16_i32_10 = arith.constant 16 : i32
    %18 = arith.index_cast %9 : i32 to index
    %c0 = arith.constant 0 : index
    %c0_11 = arith.constant 0 : index
    %19 = vector.load %arg7[%18, %c0, %c0_11] : memref<2x16x256xf32, #tpu.memory_space<vmem>>, vector<1x16x256xf32>
    %20 = vector.shape_cast %19 : vector<1x16x256xf32> to vector<16x256xf32>
    %c0_12 = arith.constant 0 : index
    %c0_13 = arith.constant 0 : index
    %21 = vector.load %arg3[%c0_12, %c0_13] : memref<16x1xf32, #tpu.memory_space<vmem>>, vector<16x1xf32>
    %22 = vector.broadcast %21 : vector<16x1xf32> to vector<16x256xf32>
    %23 = arith.mulf %20, %22 : vector<16x256xf32>
    %c0_14 = arith.constant 0 : index
    %c0_15 = arith.constant 0 : index
    %24 = vector.load %arg6[%c0_14, %c0_15] : memref<16x256xf32, #tpu.memory_space<vmem>>, vector<16x256xf32>
    tpu.vector_store %arg6[%c0_14, %c0_15], %23 {strides = array<i32>} : memref<16x256xf32, #tpu.memory_space<vmem>>, vector<16x256xf32>,
    return
  }
  func.func @transform_0(%arg0: i32, %arg1: memref<32xi32, #tpu.memory_space<smem>>, %arg2: memref<32xi32, #tpu.memory_space<smem>>) -> (i32, i32) {
    %c0_i32 = arith.constant 0 : i32
    %c0_i32_0 = arith.constant 0 : i32
    return %arg0, %c0_i32 : i32, i32
  }
  func.func @transform_3(%arg0: i32, %arg1: memref<32xi32, #tpu.memory_space<smem>>, %arg2: memref<32xi32, #tpu.memory_space<smem>>) -> (i32, i32) {
    %c0_i32 = arith.constant 0 : i32
    %c0_i32_0 = arith.constant 0 : i32
    return %arg0, %c0_i32 : i32, i32
  }
}

</mosaic_0001>

<bundles_post_ra>
// kernel: tpu_custom_call.1
= control target key start
LH: loop header
LB: loop body
LE: loop exit
PB: predicated region body
PF: predicated region fallthrough
CT: control target
= control target key end

     0   :  { %s1400_s0 = inlined_call_operand.vmem [shape: s32[32], index: 0, kind: input, shape index: {}]   ;;  %s1401_s2 = inlined_call_operand.vmem [shape: f32[32,1], index: 2, kind: input, shape index: {}]   ;;  %s1402_s3 = inlined_call_operand.hbm [shape: f32[250,256], index: 3, kind: input, shape index: {}]   ;;  %s1403_s4 = inlined_call_operand.vmem [shape: f32[4,256], index: 4, kind: input, shape index: {}]   ;;  %s1404_s5 = inlined_call_operand.hbm [shape: f32[32,256], index: 5, kind: output, shape index: {}]   ;;  %s1405_s1 = inlined_call_operand.vmem [shape: s32[32], index: 1, kind: input, shape index: {}]  }
   0x1   :  { %1412 = sst [smem:[#allocation23_spill]] %s1401_s2  ;;  %s10_s20 = sshll.u32 %s1400_s0, 4  ;;  %s11_s20 = int_to_ptr.vmem [resolvable:$true] %s10_s20 }
   0x2   :  { %1413 = sst [smem:[#allocation24_spill]] %s1403_s4  ;;  %s14_s23 = sshll.u32 %s1405_s1, 4  ;;  %s15_s23 = int_to_ptr.vmem [resolvable:$true] %s14_s23 }
   0x3   :  { %s924_s24 = scalar_lea.vmem %s11_s20, 16  ;;  %p929_p1 = scmp.lt.s32.totalorder %s11_s20, %s11_s20 }
   0x4   :  { %p925_p0 = scmp.ne.s32.totalorder %s11_s20, %s924_s24  ;;  %p930_p2 = scmp.lt.s32.totalorder %s924_s24, %s924_s24 }
   0x6   :  { %p931_p3 = por %p930_p2, %p929_p1 }
   0x8   :  { %p932_p4 = pnand %p931_p3, %p925_p0 }
   0xa   :  { %935 = shalt.err (!%p932_p4)  }
   0xb   :  { %s1096_s25 = smov [#allocation5]   ;;  %s936_s26 = scalar_lea.vmem %s15_s23, 16 }
   0xc   :  { %13 = dma.vmem_to_smem %s11_s20, 16, %s1096_s25, [#allocation4] }
   0xd   :  { %p937_p5 = scmp.ne.s32.totalorder %s15_s23, %s936_s26  ;;  %p941_p6 = scmp.lt.s32.totalorder %s15_s23, %s15_s23 }
   0xe   :  { %p942_p7 = scmp.lt.s32.totalorder %s936_s26, %s936_s26 }
  0x10   :  { %p943_p8 = por %p942_p7, %p941_p6 }
  0x12   :  { %p944_p9 = pnand %p943_p8, %p937_p5 }
  0x14   :  { %947 = shalt.err (!%p944_p9)  }
  0x15   :  { %s1097_s0 = smov [#allocation6]  }
  0x16   :  { %17 = dma.vmem_to_smem %s15_s23, 16, %s1097_s0, [#allocation4] }
  0x17   :  { %1060 = dma.done.wait [#allocation4], 32 }
  0x18   :  { %1061 = vsyncadd [#allocation4], 4294967264 }
  0x19   :  { %19 = sfence }
  0x1a   :  { %20 = vsyncpa [#allocation8], 0 }
  0x1b   :  { %22 = vsyncpa [#allocation8 + $0x1], 0  ;;  %s1144_s1 = smov 0   ;;  %s1146_s27 = smov 0  }
  0x1c   :  { %s1148_s28 = smov 0   ;;  %s1150_s29 = smov 0  }
  0x1d LB: > { %1414 = sst [smem:[#allocation18_spill]] %s1070_s1  ;;  %s1165_s30 = sadd.s32 4294967295, %s1082_s29   ;;  %s1082_s29 = sphi %s1150_s29, %s1428_s29   ;;  %s1078_s28 = sphi %s1148_s28, %s1430_s28   ;;  %s1074_s27 = sphi %s1146_s27, %s1432_s27   ;;  %s1070_s1 = sphi %s1144_s1, %s1431_s1  }
  0x1e   : > { %1415 = sst [smem:[#allocation19_spill]] %s1078_s28  ;;  %s764_s6 = sadd.s32 4294967294, %s1082_s29  }
  0x1f   : > { %s1169_s7 = sadd.s32 1, %s1082_s29   ;;  %s61_s8 = sadd.s32 1, %s1078_s28 }
  0x20   : > { %1416 = sst [smem:[#allocation20_spill]] %s1169_s7  ;;  %s58_s9 = ssub.s32 %s1082_s29, %s1169_s7 }
  0x21   : > { %p71_p10 = scmp.ne.s32.totalorder %s1078_s28, %s1074_s27  ;;  %p59_p11 = scmp.eq.s32.totalorder %s58_s9, 0 }
  0x22   : > { %p72_p12 = scmp.eq.s32.totalorder %s1165_s30, 1  ;;  %p77_p13 = scmp.ne.s32.totalorder %s1074_s27, %s1070_s1 }
  0x23   : > { %p78_p0 = scmp.eq.s32.totalorder %s764_s6, 1  ;;  %p767_p3 = scmp.ge.s32.totalorder %s1082_s29, 1 }
  0x24   : > { %s1180_s10 = scalar_select %p59_p11, %s1078_s28, %s61_s8  }
  0x25   : > { %p1182_p1 = por %p72_p12, %p71_p10  ;;  %p1186_p2 = por %p78_p0, %p77_p13 }
  0x26   : > { %1417 = sst [smem:[#allocation21_spill]] %s1180_s10  ;;  %p105_p4 = scmp.lt.s32.totalorder %s1082_s29, 3 }
  0x27   : > { %s1419_s12 = scalar_select %p1186_p2, 1, 0 }
  0x28   : > { %p106_p5 = pnand %p767_p3, %p105_p4 }
  0x29   : > { %1420 = sst [smem:[#allocation22_spill]] %s1419_s12  ;;  %s1406_s13 = sand.u32 (!%p106_p5), 1, %s1074_s27  }
  0x2a   : > { %109 = sbr.rel (%p106_p5) target bundleno = 363 (0x16b), region = 24  ;;  %s769_s14 = sshll.u32 (!%p106_p5), %s1165_s30, 1 }
  0x2b   : > { %s768_s15 = sshll.u32 (!%p106_p5), %s1406_s13, 5  ;;  %p126_p6 = scmp.lt.s32.totalorder (!%p106_p5), %s769_s14, 3 }
  0x2c   : > { %p132_p7 = scmp.lt.s32.totalorder (!%p106_p5), %s1165_s30, 0  ;;  %s133_s16 = ssub.s32 (!%p106_p5), 0, %s1165_s30 }
  0x2d   : > { %s771_s18 = smin.u32 (!%p106_p5), %s1165_s30, %s133_s16  ;;  %s1421_s2 = sld [smem:[#allocation23_spill]] (!%p106_p5) }
  0x2e   : > { %s135_s22 = sand.u32 (!%p106_p5), 1, %s771_s18   ;;  %s1206_s25 = scalar_lea.vmem (!%p106_p5), [#allocation7], %s768_s15 }
  0x2f   : > { %s136_s23 = ssub.s32 (!%p106_p5), 0, %s135_s22  ;;  %p774_p9 = scmp.ne.s32.totalorder (!%p106_p5), %s1165_s30, 0 }
  0x31   : > { %s1434_s14 = smov (!%p126_p6, %s769_s14), 3  ;;  %s1436_s23 = smov (!%p132_p7, %s136_s23), %s135_s22 }
  0x32   : > { %s770_s17 = sshll.u32 %s1434_s14, 3  ;;  %p773_p8 = scmp.lt.s32.totalorder %s1436_s23, 0 }
  0x33   : > { %s1202_s21 = scalar_lea.vmem %s1421_s2, %s770_s17  ;;  %s142_s24 = sadd.s32 2, %s1436_s23 }
  0x34   : > { %s1438_s24 = smov (!%p773_p8, %s142_s24), %s1436_s23  ;;  %147 = sbr.rel (%p774_p9) target bundleno = 126 (0x7e), region = 28 }
  0x35   : > { %s1209_s26 = smov (!%p774_p9), 0  }
  0x3b LB: >> { %s1215_s0 = sld [smem:[#allocation6 + %s1086_s26]]  ;;  %s1086_s26 = sphi %s1209_s26, %s153_s26  }
  0x41   : >> { %p775_p10 = scmp.lt.s32.totalorder %s1215_s0, 0 }
  0x42   : >> { %s159_s6 = sshrl.u32 (!%p775_p10), %s1215_s0, 2  ;;  %s160_s8 = sand.u32 (!%p775_p10), 3, %s1215_s0  }
  0x43   : >> { %158 = sbr.rel (%p775_p10) target bundleno = 79 (0x4f), region = 39  ;;  %s776_s9 = sshll.u32 (!%p775_p10), %s159_s6, 3 }
  0x44   : >> { %s164_s14 = sshrl.u32 (!%p775_p10), %s1086_s26, 3  ;;  %s162_s15 = sadd.s32 (!%p775_p10), %s776_s9, %s160_s8 }
  0x45   : >> { %s165_s16 = sand.u32 (!%p775_p10), 7, %s1086_s26   ;;  %s1422_s4 = sld [smem:[#allocation24_spill]] (!%p775_p10) }
  0x46   : >> { %s777_s20 = sshll.u32 (!%p775_p10), %s164_s14, 4  ;;  %s169_s13 = scalar_lea.sflag (!%p775_p10), [#allocation3], %s1086_s26 }
  0x47   : >> { %s167_s22 = sadd.s32 (!%p775_p10), %s777_s20, %s165_s16 }
  0x48   : >> { %s168_s23 = scalar_lea.vmem (!%p775_p10), [#allocation2], %s167_s22 }
  0x4b   : >> { %s163_s19 = scalar_lea.vmem %s1422_s4, %s162_s15 }
  0x4c   : >> { %v187_v0 = vld [vmem:[%s163_s19] sm:$0x1]  ;;  %v189_v1 = vld [vmem:[%s163_s19 + $0x4] sm:$0x1] }
  0x4d   : >> { %188 = vst [vmem:[%s168_s23] sm:$0x1] %v187_v0  ;;  %190 = vst [vmem:[%s168_s23 + $0x8] sm:$0x1] %v189_v1 }
  0x4e   : >> { %217 = vsyncadd %s169_s13, 32 }
  0x4f PF: >> { %s229_s6 = sshrl.u32 %s1086_s26, 3  ;;  %s230_s14 = sand.u32 7, %s1086_s26  }
  0x50   : >> { %s842_s8 = scalar_select %p775_p10, [#allocation5], [#allocation13] }
  0x51   : >> { %s843_s9 = scalar_select %p775_p10, %s1086_s26, 0 }
  0x52   : >> { %s781_s15 = sshll.u32 %s229_s6, 4  ;;  %s234_s6 = scalar_lea.sflag [#allocation3], %s1086_s26 }
  0x53   : >> { %s222_s16 = sld [smem:[%s842_s8 + %s843_s9]]  ;;  %s232_s17 = sadd.s32 %s781_s15, %s230_s14 }
  0x54   : >> { %s233_s18 = scalar_lea.vmem [#allocation2], %s232_s17  ;;  %s952_s15 = scalar_lea.hbm %s1402_s3, 8192 }
  0x55   : >> { %s236_s19 = sshll.u32 %s233_s18, 4  ;;  %s1235_s19 = int_to_ptr.vmem [resolvable:$true] %s236_s19 }
  0x59   : >> { %s223_s13 = sshrl.u32 %s222_s16, 3  ;;  %s224_s20 = sand.u32 7, %s222_s16  }
  0x5a   : >> { %s779_s22 = sshll.u32 %s223_s13, 4 }
  0x5b   : >> { %s226_s23 = sadd.s32 %s779_s22, %s224_s20 }
  0x5c   : >> { %s780_s2 = sshll.u32 %s226_s23, 4 }
  0x5d   : >> { %s1240_s7 = scalar_lea.hbm %s1402_s3, %s780_s2 }
  0x5e   : >> { %s948_s8 = scalar_lea.hbm %s1240_s7, 32  ;;  %p953_p0 = scmp.lt.u32.totalorder %s1240_s7, %s1402_s3 }
  0x5f   : >> { %p949_p11 = scmp.ne.s32.totalorder %s1240_s7, %s948_s8  ;;  %p954_p3 = scmp.lt.u32.totalorder %s952_s15, %s948_s8 }
  0x60   : >> { %p956_p5 = scmp.lt.u32.totalorder %s948_s8, %s1240_s7 }
  0x61   : >> { %p950_p12 = pnand %p949_p11, %p775_p10  ;;  %p955_p4 = por %p954_p3, %p953_p0 }
  0x63   : >> { %p951_p13 = pneg %p950_p12  ;;  %p957_p6 = por %p956_p5, %p955_p4 }
  0x65   : >> { %p958_p7 = pnand %p957_p6, %p951_p13 }
  0x67   : >> { %961 = shalt.err (!%p958_p7)  }
  0x68   : >> { %s962_s2 = scalar_lea.vmem %s1235_s19, 32  ;;  %s1098_s28 = smov [#allocation2]  }
  0x69   : >> { %p963_p8 = scmp.ne.s32.totalorder %s1235_s19, %s962_s2  ;;  %s966_s10 = sshll.u32 %s1098_s28, 4  ;;  %s967_s10 = int_to_ptr.vmem [resolvable:$false] %s966_s10 }
  0x6a   : >> { %s968_s18 = scalar_lea.vmem %s967_s10, 1024  ;;  %p969_p12 = scmp.lt.s32.totalorder %s1235_s19, %s967_s10 }
  0x6b   : >> { %p964_p9 = pnand %p963_p8, %p775_p10  ;;  %p970_p2 = scmp.lt.s32.totalorder %s968_s18, %s962_s2 }
  0x6d   : >> { %p965_p11 = pneg %p964_p9  ;;  %p971_p0 = por %p970_p2, %p969_p12 }
  0x6f   : >> { %p972_p3 = pnand %p971_p0, %p965_p11 }
  0x71   : >> { %975 = shalt.err (!%p972_p3)  }
  0x72   : >> { %s1099_s13 = smov 128   ;;  %s1100_s20 = smov 1  }
  0x73   : >> { %844 = dma.hbm_to_vmem [thread:$0]  (%p775_p10), %s1240_s7, 32, %s1235_s19, %s234_s6, %s1099_s13, %s1099_s13, %s1100_s20 }
  0x74   : >> { %s153_s26 = sadd.s32 1, %s1086_s26  }
  0x75   : >> { %p150_p13 = scmp.ge.s32.totalorder %s153_s26, 16  }
  0x77   : > { %152 = sbr.rel (!%p150_p13) target bundleno = 59 (0x3b), region = 229 }
  0x7e PF: > { %s240_s22 = sadd.s32 1, %s1165_s30 }
  0x7f   : > { %p782_p2 = scmp.ge.s32.totalorder %s240_s22, 2 }
  0x80   : > { %s1271_s23 = ssub.s32 (!%p782_p2), 1, %s1438_s24  ;;  %s1273_s8 = smov (!%p782_p2), 0  }
  0x81   : > { %244 = sbr.rel (%p782_p2) target bundleno = 205 (0xcd), region = 77 }
  0x88 LB: >> { %s836_s7 = sshll.u32 %s1165_s30, 4  ;;  %s1090_s8 = sphi %s1273_s8, %s251_s8  }
  0x89   : >> { %s837_s26 = sadd.s32 16, %s836_s7 }
  0x8a   : >> { %s253_s0 = sadd.s32 %s1090_s8, %s837_s26 }
  0x8b   : >> { %s1280_s19 = sld [smem:[#allocation6 + %s253_s0]] }
  0x91   : >> { %p784_p10 = scmp.lt.s32.totalorder %s1280_s19, 0 }
  0x92   : >> { %s259_s6 = sshrl.u32 (!%p784_p10), %s1280_s19, 2  ;;  %s260_s9 = sand.u32 (!%p784_p10), 3, %s1280_s19  }
  0x93   : >> { %258 = sbr.rel (%p784_p10) target bundleno = 159 (0x9f), region = 88  ;;  %s785_s14 = sshll.u32 (!%p784_p10), %s259_s6, 3 }
  0x94   : >> { %s264_s15 = sshrl.u32 (!%p784_p10), %s1090_s8, 3  ;;  %s262_s16 = sadd.s32 (!%p784_p10), %s785_s14, %s260_s9 }
  0x95   : >> { %s265_s17 = sand.u32 (!%p784_p10), 7, %s1090_s8   ;;  %s1423_s4 = sld [smem:[#allocation24_spill]] (!%p784_p10) }
  0x96   : >> { %s786_s18 = sshll.u32 (!%p784_p10), %s264_s15, 4  ;;  %s787_s20 = sshll.u32 (!%p784_p10), %s1271_s23, 5 }
  0x97   : >> { %s267_s13 = sadd.s32 (!%p784_p10), %s786_s18, %s265_s17  ;;  %s788_s7 = sshll.u32 (!%p784_p10), %s1271_s23, 4 }
  0x98   : >> { %s269_s22 = sadd.s32 (!%p784_p10), %s787_s20, %s267_s13  ;;  %s272_s26 = sadd.s32 (!%p784_p10), %s1090_s8, %s788_s7 }
  0x99   : >> { %s270_s12 = scalar_lea.vmem (!%p784_p10), [#allocation2], %s269_s22  ;;  %s273_s1 = scalar_lea.sflag (!%p784_p10), [#allocation3], %s272_s26 }
  0x9b   : >> { %s263_s10 = scalar_lea.vmem %s1423_s4, %s262_s16 }
  0x9c   : >> { %v291_v2 = vld [vmem:[%s263_s10] sm:$0x1]  ;;  %v293_v3 = vld [vmem:[%s263_s10 + $0x4] sm:$0x1] }
  0x9d   : >> { %292 = vst [vmem:[%s270_s12] sm:$0x1] %v291_v2  ;;  %294 = vst [vmem:[%s270_s12 + $0x8] sm:$0x1] %v293_v3 }
  0x9e   : >> { %321 = vsyncadd %s273_s1, 32 }
  0x9f PF: >> { %s333_s6 = sshrl.u32 %s1090_s8, 3  ;;  %s1440_s0 = smov (!%p784_p10, %s253_s0), 0 }
  0xa0   : >> { %s846_s9 = scalar_select %p784_p10, [#allocation5], [#allocation14] }
  0xa1   : >> { %s334_s14 = sand.u32 7, %s1090_s8   ;;  %s792_s15 = sshll.u32 %s333_s6, 4 }
  0xa2   : >> { %s326_s16 = sld [smem:[%s846_s9 + %s1440_s0]]  ;;  %s336_s17 = sadd.s32 %s792_s15, %s334_s14 }
  0xa3   : >> { %s793_s12 = sshll.u32 %s1271_s23, 5  ;;  %s794_s1 = sshll.u32 %s1271_s23, 4 }
  0xa4   : >> { %s338_s2 = sadd.s32 %s793_s12, %s336_s17  ;;  %s1304_s28 = sadd.s32 %s1090_s8, %s794_s1 }
  0xa5   : >> { %s339_s10 = scalar_lea.vmem [#allocation2], %s338_s2  ;;  %s342_s9 = scalar_lea.sflag [#allocation3], %s1304_s28 }
  0xa6   : >> { %s344_s18 = sshll.u32 %s339_s10, 4  ;;  %s980_s17 = scalar_lea.hbm %s1402_s3, 8192  ;;  %s1306_s18 = int_to_ptr.vmem [resolvable:$true] %s344_s18 }
  0xa8   : >> { %s327_s13 = sshrl.u32 %s326_s16, 3  ;;  %s328_s20 = sand.u32 7, %s326_s16  }
  0xa9   : >> { %s790_s22 = sshll.u32 %s327_s13, 4 }
  0xaa   : >> { %s330_s7 = sadd.s32 %s790_s22, %s328_s20 }
  0xab   : >> { %s791_s26 = sshll.u32 %s330_s7, 4 }
  0xac   : >> { %s1311_s0 = scalar_lea.hbm %s1402_s3, %s791_s26 }
  0xad   : >> { %s976_s14 = scalar_lea.hbm %s1311_s0, 32  ;;  %p981_p7 = scmp.lt.u32.totalorder %s1311_s0, %s1402_s3 }
  0xae   : >> { %p977_p4 = scmp.ne.s32.totalorder %s1311_s0, %s976_s14  ;;  %p982_p8 = scmp.lt.u32.totalorder %s980_s17, %s976_s14 }
  0xaf   : >> { %p984_p11 = scmp.lt.u32.totalorder %s976_s14, %s1311_s0 }
  0xb0   : >> { %p978_p5 = pnand %p977_p4, %p784_p10  ;;  %p983_p9 = por %p982_p8, %p981_p7 }
  0xb2   : >> { %p979_p6 = pneg %p978_p5  ;;  %p985_p12 = por %p984_p11, %p983_p9 }
  0xb4   : >> { %p986_p0 = pnand %p985_p12, %p979_p6 }
  0xb6   : >> { %989 = shalt.err (!%p986_p0)  }
  0xb7   : >> { %s990_s4 = scalar_lea.vmem %s1306_s18, 32  ;;  %s1101_s2 = smov [#allocation2]  }
  0xb8   : >> { %p991_p3 = scmp.ne.s32.totalorder %s1306_s18, %s990_s4  ;;  %s994_s10 = sshll.u32 %s1101_s2, 4  ;;  %s995_s10 = int_to_ptr.vmem [resolvable:$false] %s994_s10 }
  0xb9   : >> { %s996_s13 = scalar_lea.vmem %s995_s10, 1024  ;;  %p997_p4 = scmp.lt.s32.totalorder %s1306_s18, %s995_s10 }
  0xba   : >> { %p992_p13 = pnand %p991_p3, %p784_p10  ;;  %p998_p5 = scmp.lt.s32.totalorder %s996_s13, %s990_s4 }
  0xbc   : >> { %p993_p2 = pneg %p992_p13  ;;  %p999_p7 = por %p998_p5, %p997_p4 }
  0xbe   : >> { %p1000_p8 = pnand %p999_p7, %p993_p2 }
  0xc0   : >> { %1003 = shalt.err (!%p1000_p8)  }
  0xc1   : >> { %s1102_s20 = smov 128   ;;  %s1103_s22 = smov 1  }
  0xc2   : >> { %848 = dma.hbm_to_vmem [thread:$0]  (%p784_p10), %s1311_s0, 32, %s1306_s18, %s342_s9, %s1102_s20, %s1102_s20, %s1103_s22 }
  0xc3   : >> { %s251_s8 = sadd.s32 1, %s1090_s8  }
  0xc4   : >> { %p248_p6 = scmp.ge.s32.totalorder %s251_s8, 16  }
  0xc6   : > { %250 = sbr.rel (!%p248_p6) target bundleno = 136 (0x88), region = 240 }
  0xcd PF: > { %s1092_s7 = smov 0  }
  0xce LB: >> { %s795_s26 = sshll.u32 %s1438_s24, 4  ;;  %s1094_s7 = sphi %s1092_s7, %s353_s7  }
  0xcf   : >> { %s355_s6 = sadd.s32 %s1094_s7, %s795_s26 }
  0xd0   : >> { %s356_s14 = scalar_lea.sflag [#allocation3], %s355_s6 }
  0xd1   : >> { %1062 = dma.done.wait %s356_s14, 32 }
  0xd2   : >> { %1063 = vsyncadd %s356_s14, 4294967264  ;;  %s353_s7 = sadd.s32 1, %s1094_s7  }
  0xd3   : >> { %p350_p9 = scmp.ge.s32.totalorder %s353_s7, 16  }
  0xd4   : > { %v366_v4 = vld [vmem:[%s1202_s21] sm:$0xff] (%p350_p9)  ;;  %v1104_v5 = vmov (%p350_p9), 0   ;;  %v367_v6 = vld [vmem:[%s1202_s21 + $0x8] sm:$0xff] (%p350_p9)  ;;  %s838_s23 = sshll.u32 (%p350_p9), %s1438_s24, 5  ;;  %s840_s19 = sshll.u32 (%p350_p9), %s1165_s30, 9 }
  0xd5   : > { %352 = sbr.rel (!%p350_p9) target bundleno = 206 (0xce), region = 251  ;;  %923 = vset.pattern.permute.xlu0 (%p350_p9), %v1104_v5  ;;  %s361_s8 = scalar_lea.vmem (%p350_p9), [#allocation2], %s838_s23 }
  0xd6   : > { %370 = vperm.xlu0 (%p350_p9), %923, %v366_v4   ;;  %v362_v7 = vld [vmem:[%s361_s8] sm:$0xff] (%p350_p9)  ;;  %v363_v8 = vld [vmem:[%s361_s8 + $0x8] sm:$0xff] (%p350_p9)  ;;  %s401_s28 = sshll.u32 (%p350_p9), %s1206_s25, 4  ;;  %v364_v12 = vld [vmem:[%s361_s8 + $0x10] sm:$0xff] (%p350_p9)  ;;  %s1351_s24 = scalar_lea.hbm (%p350_p9), %s1404_s5, %s840_s19  ;;  %s1353_s28 = int_to_ptr.vmem [resolvable:$true] %s401_s28 }
  0xd7   : > { %v365_v13 = vld [vmem:[%s361_s8 + $0x18] sm:$0xff] (%p350_p9)  ;;  %s1424_s30 = sand.u32 (%p350_p9), 1, %s1074_s27   ;;  %s1004_s9 = scalar_lea.vmem (%p350_p9), %s1353_s28, 512 }
  0xd8   : > { %s1359_s0 = scalar_lea.sflag (%p350_p9), [#allocation8], %s1424_s30  ;;  %p1005_p10 = scmp.ne.s32.totalorder (%p350_p9), %s1353_s28, %s1004_s9 }
  0xd9   : > { %s1105_s15 = smov (%p350_p9), [#allocation7]  }
  0xda   : > { %375 = vperm.xlu0 (%p350_p9), %923, %v367_v6   ;;  %p1006_p11 = pnand (%p350_p9), %p1005_p10, %p1182_p1  ;;  %s1008_s16 = sshll.u32 (%p350_p9), %s1105_s15, 4  ;;  %s1009_s16 = int_to_ptr.vmem [resolvable:$false] %s1008_s16 }
  0xdb   : > { %s1010_s17 = scalar_lea.vmem (%p350_p9), %s1009_s16, 1024  ;;  %p1011_p0 = scmp.lt.s32.totalorder (%p350_p9), %s1353_s28, %s1009_s16 }
  0xdc   : > { %p1007_p12 = pneg %p1006_p11  ;;  %p1012_p3 = scmp.lt.s32.totalorder %s1010_s17, %s1004_s9 }
  0xde   : > { %p1013_p13 = por %p1012_p3, %p1011_p0 }
  0xe0   : > { %p1014_p2 = pnand %p1013_p13, %p1007_p12 }
 0x155   : > { %v371_v9 = vpop.permute.xlu0 %370 }
 0x156   : > { %v378_v10 = vmul.f32 %v371_v9, %v362_v7  ;;  %v379_v11 = vmul.f32 %v371_v9, %v363_v8 }
 0x158   : > { %382 = vst [vmem:[%s1206_s25] sm:$0xff] %v378_v10  ;;  %383 = vst [vmem:[%s1206_s25 + $0x8] sm:$0xff] %v379_v11 }
 0x159   : > { %v376_v14 = vpop.permute.xlu0 %375 }
 0x15a   : > { %v380_v15 = vmul.f32 %v376_v14, %v364_v12  ;;  %v381_v16 = vmul.f32 %v376_v14, %v365_v13 }
 0x15c   : > { %384 = vst [vmem:[%s1206_s25 + $0x10] sm:$0xff] %v380_v15  ;;  %385 = vst [vmem:[%s1206_s25 + $0x18] sm:$0xff] %v381_v16 }
 0x15d   : > { %1017 = shalt.err (!%p1014_p2)
}
 0x15e   : > { %s1018_s25 = scalar_lea.hbm %s1351_s24, 512  ;;  %s1022_s4 = scalar_lea.hbm %s1404_s5, 1024 }
 0x15f   : > { %p1019_p4 = scmp.ne.s32.totalorder %s1351_s24, %s1018_s25  ;;  %p1023_p8 = scmp.lt.u32.totalorder %s1351_s24, %s1404_s5 }
 0x160   : > { %p1024_p6 = scmp.lt.u32.totalorder %s1022_s4, %s1018_s25  ;;  %p1026_p10 = scmp.lt.u32.totalorder %s1018_s25, %s1351_s24 }
 0x161   : > { %p1020_p5 = pnand %p1019_p4, %p1182_p1 }
 0x162   : > { %p1025_p9 = por %p1024_p6, %p1023_p8 }
 0x163   : > { %p1021_p7 = pneg %p1020_p5 }
 0x164   : > { %p1027_p11 = por %p1026_p10, %p1025_p9 }
 0x166   : > { %p1028_p12 = pnand %p1027_p11, %p1021_p7 }
 0x168   : > { %1031 = shalt.err (!%p1028_p12)
}
 0x169   : > { %s1106_s13 = smov 256   ;;  %s1107_s20 = smov 16  }
 0x16a   : > { %849 = dma.vmem_to_hbm [thread:$0]  (%p1182_p1), %s1353_s28, 512, %s1351_s24, %s1359_s0, %s1106_s13, %s1106_s13, %s1107_s20  }
 0x16b PF: > { %s1425_s22 = sld [smem:[#allocation18_spill]]  ;;  %s1426_s7 = sld [smem:[#allocation22_spill]] }
 0x16c   : > { %p857_p0 = scmp.ge.s32.totalorder %s1082_s29, 2 }
 0x171   : > { %s416_s26 = sand.u32 1, %s1425_s22   ;;  %p1427_p3 = scmp.ne.s32.totalorder %s1426_s7, 0 }
 0x172   : > { %s417_s6 = scalar_lea.sflag [#allocation8], %s416_s26 }
 0x173   : > { %p852_p13 = pnand %p857_p0, %p1427_p3 }
 0x175   : > { %1065 = dma.done.wait (!%p852_p13), %s417_s6, 512  }
 0x176   : > { %1067 = vsyncadd (!%p852_p13), %s417_s6, 4294966784  ;;  %s1428_s29 = sld [smem:[#allocation20_spill]]  ;;  %s1429_s14 = sld [smem:[#allocation19_spill]] }
 0x177   : > { %s1430_s28 = sld [smem:[#allocation21_spill]]  ;;  %s1431_s1 = smov %s1074_s27 }
 0x17c   : > { %p25_p2 = scmp.ge.s32.totalorder %s1428_s29, 4   ;;  %s1432_s27 = smov %s1429_s14 }
 0x17e   :  { %27 = sbr.rel (!%p25_p2) target bundleno = 29 (0x1d), region = 262 }
 0x185   :  { %422 = vsyncpa [#allocation8], 1 }
 0x186   :  { %424 = vsyncpa [#allocation8 + $0x1], 1 }
 0x187   :  { %425 = vsyncmov [#allocation3] }
 0x18a   :  { %s426_s11 = vpop.sfrf %425 }
 0x18b   :  { %p804_p1 = scmp.ne.s32.totalorder %s426_s11, 0 }
 0x18d   :  { %430 = shalt.err (%p804_p1)  }
 0x18e   :  { %432 = vsyncmov [#allocation3 + $0x1] }
 0x191   :  { %s433_s23 = vpop.sfrf %432 }
 0x192   :  { %p805_p4 = scmp.ne.s32.totalorder %s433_s23, 0 }
 0x194   :  { %437 = shalt.err (%p805_p4)  }
 0x195   :  { %439 = vsyncmov [#allocation3 + $0x2] }
 0x198   :  { %s440_s8 = vpop.sfrf %439 }
 0x199   :  { %p806_p5 = scmp.ne.s32.totalorder %s440_s8, 0 }
 0x19b   :  { %444 = shalt.err (%p806_p5)  }
 0x19c   :  { %446 = vsyncmov [#allocation3 + $0x3] }
 0x19f   :  { %s447_s19 = vpop.sfrf %446 }
 0x1a0   :  { %p807_p7 = scmp.ne.s32.totalorder %s447_s19, 0 }
 0x1a2   :  { %451 = shalt.err (%p807_p7)  }
 0x1a3   :  { %453 = vsyncmov [#allocation3 + $0x4] }
 0x1a6   :  { %s454_s29 = vpop.sfrf %453 }
 0x1a7   :  { %p808_p8 = scmp.ne.s32.totalorder %s454_s29, 0 }
 0x1a9   :  { %458 = shalt.err (%p808_p8)  }
 0x1aa   :  { %460 = vsyncmov [#allocation3 + $0x5] }
 0x1ad   :  { %s461_s3 = vpop.sfrf %460 }
 0x1ae   :  { %p809_p6 = scmp.ne.s32.totalorder %s461_s3, 0 }
 0x1b0   :  { %465 = shalt.err (%p809_p6)  }
 0x1b1   :  { %467 = vsyncmov [#allocation3 + $0x6] }
 0x1b4   :  { %s468_s5 = vpop.sfrf %467 }
 0x1b5   :  { %p810_p9 = scmp.ne.s32.totalorder %s468_s5, 0 }
 0x1b7   :  { %472 = shalt.err (%p810_p9)  }
 0x1b8   :  { %474 = vsyncmov [#allocation3 + $0x7] }
 0x1bb   :  { %s475_s27 = vpop.sfrf %474 }
 0x1bc   :  { %p811_p10 = scmp.ne.s32.totalorder %s475_s27, 0 }
 0x1be   :  { %479 = shalt.err (%p811_p10)  }
 0x1bf   :  { %481 = vsyncmov [#allocation3 + $0x8] }
 0x1c2   :  { %s482_s28 = vpop.sfrf %481 }
 0x1c3   :  { %p812_p11 = scmp.ne.s32.totalorder %s482_s28, 0 }
 0x1c5   :  { %486 = shalt.err (%p812_p11)  }
 0x1c6   :  { %488 = vsyncmov [#allocation3 + $0x9] }
 0x1c9   :  { %s489_s21 = vpop.sfrf %488 }
 0x1ca   :  { %p813_p12 = scmp.ne.s32.totalorder %s489_s21, 0 }
 0x1cc   :  { %493 = shalt.err (%p813_p12)  }
 0x1cd   :  { %495 = vsyncmov [#allocation3 + $0xa] }
 0x1d0   :  { %s496_s18 = vpop.sfrf %495 }
 0x1d1   :  { %p814_p0 = scmp.ne.s32.totalorder %s496_s18, 0 }
 0x1d3   :  { %500 = shalt.err (%p814_p0)  }
 0x1d4   :  { %502 = vsyncmov [#allocation3 + $0xb] }
 0x1d7   :  { %s503_s24 = vpop.sfrf %502 }
 0x1d8   :  { %p815_p3 = scmp.ne.s32.totalorder %s503_s24, 0 }
 0x1da   :  { %507 = shalt.err (%p815_p3)  }
 0x1db   :  { %509 = vsyncmov [#allocation3 + $0xc] }
 0x1de   :  { %s510_s30 = vpop.sfrf %509 }
 0x1df   :  { %p816_p13 = scmp.ne.s32.totalorder %s510_s30, 0 }
 0x1e1   :  { %514 = shalt.err (%p816_p13)  }
 0x1e2   :  { %516 = vsyncmov [#allocation3 + $0xd] }
 0x1e5   :  { %s517_s0 = vpop.sfrf %516 }
 0x1e6   :  { %p817_p2 = scmp.ne.s32.totalorder %s517_s0, 0 }
 0x1e8   :  { %521 = shalt.err (%p817_p2)  }
 0x1e9   :  { %523 = vsyncmov [#allocation3 + $0xe] }
 0x1ec   :  { %s524_s9 = vpop.sfrf %523 }
 0x1ed   :  { %p818_p1 = scmp.ne.s32.totalorder %s524_s9, 0 }
 0x1ef   :  { %528 = shalt.err (%p818_p1)  }
 0x1f0   :  { %530 = vsyncmov [#allocation3 + $0xf] }
 0x1f3   :  { %s531_s15 = vpop.sfrf %530 }
 0x1f4   :  { %p819_p4 = scmp.ne.s32.totalorder %s531_s15, 0 }
 0x1f6   :  { %535 = shalt.err (%p819_p4)  }
 0x1f7   :  { %537 = vsyncmov [#allocation3 + $0x10] }
 0x1fa   :  { %s538_s16 = vpop.sfrf %537 }
 0x1fb   :  { %p820_p5 = scmp.ne.s32.totalorder %s538_s16, 0 }
 0x1fd   :  { %542 = shalt.err (%p820_p5)  }
 0x1fe   :  { %544 = vsyncmov [#allocation3 + $0x11] }
 0x201   :  { %s545_s17 = vpop.sfrf %544 }
 0x202   :  { %p821_p7 = scmp.ne.s32.totalorder %s545_s17, 0 }
 0x204   :  { %549 = shalt.err (%p821_p7)  }
 0x205   :  { %551 = vsyncmov [#allocation3 + $0x12] }
 0x208   :  { %s552_s25 = vpop.sfrf %551 }
 0x209   :  { %p822_p8 = scmp.ne.s32.totalorder %s552_s25, 0 }
 0x20b   :  { %556 = shalt.err (%p822_p8)  }
 0x20c   :  { %558 = vsyncmov [#allocation3 + $0x13] }
 0x20f   :  { %s559_s12 = vpop.sfrf %558 }
 0x210   :  { %p823_p6 = scmp.ne.s32.totalorder %s559_s12, 0 }
 0x212   :  { %563 = shalt.err (%p823_p6)  }
 0x213   :  { %565 = vsyncmov [#allocation3 + $0x14] }
 0x216   :  { %s566_s1 = vpop.sfrf %565 }
 0x217   :  { %p824_p9 = scmp.ne.s32.totalorder %s566_s1, 0 }
 0x219   :  { %570 = shalt.err (%p824_p9)  }
 0x21a   :  { %572 = vsyncmov [#allocation3 + $0x15] }
 0x21d   :  { %s573_s4 = vpop.sfrf %572 }
 0x21e   :  { %p825_p10 = scmp.ne.s32.totalorder %s573_s4, 0 }
 0x220   :  { %577 = shalt.err (%p825_p10)  }
 0x221   :  { %579 = vsyncmov [#allocation3 + $0x16] }
 0x224   :  { %s580_s2 = vpop.sfrf %579 }
 0x225   :  { %p826_p11 = scmp.ne.s32.totalorder %s580_s2, 0 }
 0x227   :  { %584 = shalt.err (%p826_p11)  }
 0x228   :  { %586 = vsyncmov [#allocation3 + $0x17] }
 0x22b   :  { %s587_s10 = vpop.sfrf %586 }
 0x22c   :  { %p827_p12 = scmp.ne.s32.totalorder %s587_s10, 0 }
 0x22e   :  { %591 = shalt.err (%p827_p12)  }
 0x22f   :  { %593 = vsyncmov [#allocation3 + $0x18] }
 0x232   :  { %s594_s13 = vpop.sfrf %593 }
 0x233   :  { %p828_p0 = scmp.ne.s32.totalorder %s594_s13, 0 }
 0x235   :  { %598 = shalt.err (%p828_p0)  }
 0x236   :  { %600 = vsyncmov [#allocation3 + $0x19] }
 0x239   :  { %s601_s20 = vpop.sfrf %600 }
 0x23a   :  { %p829_p3 = scmp.ne.s32.totalorder %s601_s20, 0 }
 0x23c   :  { %605 = shalt.err (%p829_p3)  }
 0x23d   :  { %607 = vsyncmov [#allocation3 + $0x1a] }
 0x240   :  { %s608_s22 = vpop.sfrf %607 }
 0x241   :  { %p830_p13 = scmp.ne.s32.totalorder %s608_s22, 0 }
 0x243   :  { %612 = shalt.err (%p830_p13)  }
 0x244   :  { %614 = vsyncmov [#allocation3 + $0x1b] }
 0x247   :  { %s615_s7 = vpop.sfrf %614 }
 0x248   :  { %p831_p2 = scmp.ne.s32.totalorder %s615_s7, 0 }
 0x24a   :  { %619 = shalt.err (%p831_p2)  }
 0x24b   :  { %621 = vsyncmov [#allocation3 + $0x1c] }
 0x24e   :  { %s622_s26 = vpop.sfrf %621 }
 0x24f   :  { %p832_p1 = scmp.ne.s32.totalorder %s622_s26, 0 }
 0x251   :  { %626 = shalt.err (%p832_p1)  }
 0x252   :  { %628 = vsyncmov [#allocation3 + $0x1d] }
 0x255   :  { %s629_s6 = vpop.sfrf %628 }
 0x256   :  { %p833_p4 = scmp.ne.s32.totalorder %s629_s6, 0 }
 0x258   :  { %633 = shalt.err (%p833_p4)  }
 0x259   :  { %635 = vsyncmov [#allocation3 + $0x1e] }
 0x25c   :  { %s636_s14 = vpop.sfrf %635 }
 0x25d   :  { %p834_p5 = scmp.ne.s32.totalorder %s636_s14, 0 }
 0x25f   :  { %640 = shalt.err (%p834_p5)  }
 0x260   :  { %642 = vsyncmov [#allocation3 + $0x1f] }
 0x263   :  { %s643_s11 = vpop.sfrf %642 }
 0x264   :  { %p835_p7 = scmp.ne.s32.totalorder %s643_s11, 0 }
 0x266   :  { %647 = shalt.err (%p835_p7)  }

</bundles_post_ra>
